<compile_context>
chip_gen: v7x
topology: tpu7x:2x2x1
jax: 0.10.0
libtpu: 0.0.40
codegen_flags: <defaults>
</compile_context>

<pallas_src>
import jax
import jax.numpy as jnp
from jax import lax
from jax.experimental import pallas as pl
from jax.experimental.pallas import tpu as pltpu


def _round_up(x, m):
    return (x + m - 1) // m * m


def _preassign_kernel(agent_ref, task_ref,
                      w1a_ref, b1a_ref, w2a_ref, b2a_ref,
                      w1t_ref, b1t_ref, w2t_ref, b2t_ref,
                      out_ref):
    """One batch element per grid step.

    agent_ref: (1, Na_pad, Da), task_ref: (1, Nt_pad, Dt)  -- compute dtype.
    Weights in compute dtype, biases f32, out_ref: (1, Na_pad, Nt_pad) f32.
    """
    cd = agent_ref.dtype  # MXU operand dtype (f32 or bf16)

    a = agent_ref[0]      # (Na_pad, Da)
    t = task_ref[0]       # (Nt_pad, Dt)

    # Agent embedding: fc1 -> relu -> fc2. MXU accumulates in f32; bias add and
    # relu stay in f32 on the VPU.
    ha = jnp.dot(a, w1a_ref[...], preferred_element_type=jnp.float32)
    ha = jnp.maximum(ha + b1a_ref[...], 0.0)
    ea = jnp.dot(ha.astype(cd), w2a_ref[...],
                 preferred_element_type=jnp.float32) + b2a_ref[...]

    # Task embedding: fc1 -> relu -> fc2.
    ht = jnp.dot(t, w1t_ref[...], preferred_element_type=jnp.float32)
    ht = jnp.maximum(ht + b1t_ref[...], 0.0)
    et = jnp.dot(ht.astype(cd), w2t_ref[...],
                 preferred_element_type=jnp.float32) + b2t_ref[...]

    # bmm(agent_emb, task_emb^T): contract the last dim of both operands
    # (A.B^T form) -- no explicit transpose of et, so no XLU vxpose.
    out_ref[0] = lax.dot_general(
        ea.astype(cd), et.astype(cd),
        dimension_numbers=(((1,), (1,)), ((), ())),
        preferred_element_type=jnp.float32)


def pre_assign_critic(tasks, agent_type, params, *, compute_dtype=jnp.float32):
    """tasks: (B, Nt, task_dim), agent_type: (B, Na, agent_dim) -> (B, Na, Nt)."""
    B, Nt, Dt = tasks.shape
    Bb, Na, Da = agent_type.shape
    assert B == Bb
    H = params["w1a"].shape[1]

    sublane = 16 if compute_dtype == jnp.bfloat16 else 8
    na_pad = _round_up(Na, sublane)          # sublane-aligned rows
    nt_pad = _round_up(max(Nt, 1), 128)      # lane-dense output last dim

    agent_p = jnp.pad(agent_type,
                      ((0, 0), (0, na_pad - Na), (0, 0))).astype(compute_dtype)
    tasks_p = jnp.pad(tasks,
                      ((0, 0), (0, nt_pad - Nt), (0, 0))).astype(compute_dtype)

    w1a = params["w1a"].astype(compute_dtype)
    w2a = params["w2a"].astype(compute_dtype)
    w1t = params["w1t"].astype(compute_dtype)
    w2t = params["w2t"].astype(compute_dtype)
    b1a = params["b1a"].reshape(1, H).astype(jnp.float32)
    b2a = params["b2a"].reshape(1, H).astype(jnp.float32)
    b1t = params["b1t"].reshape(1, H).astype(jnp.float32)
    b2t = params["b2t"].reshape(1, H).astype(jnp.float32)

    vmem = pltpu.MemorySpace.VMEM

    def batch_spec(arr):
        # Per-batch block, pipelined over the grid.
        return pl.BlockSpec((1,) + arr.shape[1:], lambda b: (b, 0, 0),
                            memory_space=vmem)

    def const_spec(arr):
        # Batch-invariant block: constant index_map -> DMA'd to VMEM once.
        return pl.BlockSpec(arr.shape, lambda b: (0,) * arr.ndim,
                            memory_space=vmem)

    in_specs = [
        batch_spec(agent_p), batch_spec(tasks_p),
        const_spec(w1a), const_spec(b1a), const_spec(w2a), const_spec(b2a),
        const_spec(w1t), const_spec(b1t), const_spec(w2t), const_spec(b2t),
    ]
    out_spec = pl.BlockSpec((1, na_pad, nt_pad), lambda b: (b, 0, 0),
                            memory_space=vmem)

    # VMEM budget: double-buffered per-step blocks + f32 intermediates + slack
    # (cap well under v7x's 64 MiB physical VMEM).
    itemsize = jnp.dtype(compute_dtype).itemsize
    blk_bytes = (na_pad * Da + nt_pad * Dt) * itemsize          # activation blocks
    blk_bytes += (Da * H + H * H + Dt * H + H * H) * itemsize   # weight blocks
    blk_bytes += 4 * H * 4                                      # f32 bias blocks
    blk_bytes += na_pad * nt_pad * 4                            # f32 output block
    interm_bytes = 2 * (na_pad * H + nt_pad * H) * 4            # ha/ea, ht/et
    vmem_limit = int(min(2 * blk_bytes + 4 * interm_bytes + (16 << 20), 64 << 20))

    grid_spec = pltpu.PrefetchScalarGridSpec(
        num_scalar_prefetch=0,
        grid=(B,),
        in_specs=in_specs,
        out_specs=out_spec,
    )

    out_padded = pl.pallas_call(
        _preassign_kernel,
        out_shape=jax.ShapeDtypeStruct((B, na_pad, nt_pad), jnp.float32),
        grid_spec=grid_spec,
        compiler_params=pltpu.CompilerParams(
            dimension_semantics=("parallel",),   # megacore sharding on v7x
            vmem_limit_bytes=vmem_limit,
        ),
    )(agent_p, tasks_p, w1a, b1a, w2a, b2a, w1t, b1t, w2t, b2t)

    # Padded rows/columns hold garbage embeddings of zero-padded inputs; slice.
    return out_padded[:, :Na, :Nt]


def _init_linear(key, fan_in, fan_out):
    # Mimic PyTorch nn.Linear default init: U(-1/sqrt(fan_in), 1/sqrt(fan_in)).
    kw, kb = jax.random.split(key)
    bound = 1.0 / jnp.sqrt(fan_in)
    # Store weight pre-transposed as (in, out).
    w = jax.random.uniform(kw, (fan_in, fan_out), jnp.float32, -bound, bound)
    b = jax.random.uniform(kb, (fan_out,), jnp.float32, -bound, bound)
    return w, b


def _reference(tasks, agent_type, p):
    def embed(x, w1, b1, w2, b2):
        h = jnp.maximum(x @ w1 + b1, 0.0)
        return h @ w2 + b2
    ea = embed(agent_type, p["w1a"], p["b1a"], p["w2a"], p["b2a"])
    et = embed(tasks, p["w1t"], p["b1t"], p["w2t"], p["b2t"])
    return jnp.einsum("bah,bth->bat", ea, et)


if __name__ == "__main__":
    B, Na, Nt = 2, 8, 8
    agent_dim, task_dim, hidden_dim = 4, 6, 32

    key = jax.random.PRNGKey(0)
    k_in1, k_in2, k1, k2, k3, k4 = jax.random.split(key, 6)

    agent_type = jax.random.normal(k_in1, (B, Na, agent_dim), jnp.float32)
    tasks = jax.random.normal(k_in2, (B, Nt, task_dim), jnp.float32)

    w1a, b1a = _init_linear(k1, agent_dim, hidden_dim)
    w2a, b2a = _init_linear(k2, hidden_dim, hidden_dim)
    w1t, b1t = _init_linear(k3, task_dim, hidden_dim)
    w2t, b2t = _init_linear(k4, hidden_dim, hidden_dim)

    params = dict(w1a=w1a, b1a=b1a, w2a=w2a, b2a=b2a,
                  w1t=w1t, b1t=b1t, w2t=w2t, b2t=b2t)

    ref = _reference(tasks, agent_type, params)

    # Default f32 MXU-operand path: tight check against the f32 reference.
    out = jax.block_until_ready(pre_assign_critic(tasks, agent_type, params))
    assert out.shape == (B, Na, Nt)
    assert jnp.allclose(out, ref, atol=1e-4, rtol=1e-4), "f32 mismatch vs reference"

    # bf16 MXU-operand path (f32 accumulation): production setting per review.
    out_bf16 = jax.block_until_ready(
        pre_assign_critic(tasks, agent_type, params, compute_dtype=jnp.bfloat16))
    assert out_bf16.shape == (B, Na, Nt)
    assert jnp.allclose(out_bf16, ref, atol=2.5e-1, rtol=1e-1), "bf16 path diverged"

    print("KERNEL_OK")
</pallas_src>

<mosaic_0001>
module attributes {stable_mosaic.version = 11 : i64} {
  func.func @_preassign_kernel(%arg0: i32, %arg1: memref<1x8x4xf32, #tpu.memory_space<vmem>>, %arg2: memref<1x128x6xf32, #tpu.memory_space<vmem>>, %arg3: memref<4x32xf32, #tpu.memory_space<vmem>>, %arg4: memref<1x32xf32, #tpu.memory_space<vmem>>, %arg5: memref<32x32xf32, #tpu.memory_space<vmem>>, %arg6: memref<1x32xf32, #tpu.memory_space<vmem>>, %arg7: memref<6x32xf32, #tpu.memory_space<vmem>>, %arg8: memref<1x32xf32, #tpu.memory_space<vmem>>, %arg9: memref<32x32xf32, #tpu.memory_space<vmem>>, %arg10: memref<1x32xf32, #tpu.memory_space<vmem>>, %arg11: memref<1x8x128xf32, #tpu.memory_space<vmem>>) attributes {dimension_semantics = [#tpu.dimension_semantics<parallel>], iteration_bounds = array<i64: 2>, scalar_prefetch = 0 : i64, scratch_operands = 0 : i64, tpu.core_type = #tpu.core_type<tc>, window_params = [{transform_indices = @transform_0, window_bounds = array<i64: 1, 8, 4>}, {transform_indices = @transform_1, window_bounds = array<i64: 1, 128, 6>}, {pipeline_mode = #tpu.pipeline_mode<synchronous>, transform_indices = @transform_2, window_bounds = array<i64: 4, 32>}, {pipeline_mode = #tpu.pipeline_mode<synchronous>, transform_indices = @transform_3, window_bounds = array<i64: 1, 32>}, {pipeline_mode = #tpu.pipeline_mode<synchronous>, transform_indices = @transform_4, window_bounds = array<i64: 32, 32>}, {pipeline_mode = #tpu.pipeline_mode<synchronous>, transform_indices = @transform_5, window_bounds = array<i64: 1, 32>}, {pipeline_mode = #tpu.pipeline_mode<synchronous>, transform_indices = @transform_6, window_bounds = array<i64: 6, 32>}, {pipeline_mode = #tpu.pipeline_mode<synchronous>, transform_indices = @transform_7, window_bounds = array<i64: 1, 32>}, {pipeline_mode = #tpu.pipeline_mode<synchronous>, transform_indices = @transform_8, window_bounds = array<i64: 32, 32>}, {pipeline_mode = #tpu.pipeline_mode<synchronous>, transform_indices = @transform_9, window_bounds = array<i64: 1, 32>}, {transform_indices = @transform_10, window_bounds = array<i64: 1, 8, 128>}]} {
    %c0 = arith.constant 0 : index
    %c0_0 = arith.constant 0 : index
    %c0_1 = arith.constant 0 : index
    %0 = vector.load %arg1[%c0, %c0_0, %c0_1] : memref<1x8x4xf32, #tpu.memory_space<vmem>>, vector<1x8x4xf32>
    %1 = vector.shape_cast %0 : vector<1x8x4xf32> to vector<8x4xf32>
    %c0_2 = arith.constant 0 : index
    %c0_3 = arith.constant 0 : index
    %c0_4 = arith.constant 0 : index
    %2 = vector.load %arg2[%c0_2, %c0_3, %c0_4] : memref<1x128x6xf32, #tpu.memory_space<vmem>>, vector<1x128x6xf32>
    %3 = vector.shape_cast %2 : vector<1x128x6xf32> to vector<128x6xf32>
    %c0_5 = arith.constant 0 : index
    %c0_6 = arith.constant 0 : index
    %4 = vector.load %arg3[%c0_5, %c0_6] : memref<4x32xf32, #tpu.memory_space<vmem>>, vector<4x32xf32>
    %cst = arith.constant dense<0.000000e+00> : vector<8x32xf32>
    %5 = tpu.matmul %1, %4, %cst {dimension_numbers = #tpu.dot_dimension_numbers<[1], [0], [0], [1], [0, 0, 1, 1], [], []>} : vector<8x4xf32>, vector<4x32xf32>, vector<8x32xf32> -> vector<8x32xf32>
    %c0_7 = arith.constant 0 : index
    %c0_8 = arith.constant 0 : index
    %6 = vector.load %arg4[%c0_7, %c0_8] : memref<1x32xf32, #tpu.memory_space<vmem>>, vector<1x32xf32>
    %7 = vector.broadcast %6 : vector<1x32xf32> to vector<8x32xf32>
    %8 = arith.addf %5, %7 : vector<8x32xf32>
    %cst_9 = arith.constant 0.000000e+00 : f32
    %9 = vector.broadcast %cst_9 : f32 to vector<8x32xf32>
    %10 = arith.maximumf %8, %9 : vector<8x32xf32>
    %c0_10 = arith.constant 0 : index
    %c0_11 = arith.constant 0 : index
    %11 = vector.load %arg5[%c0_10, %c0_11] : memref<32x32xf32, #tpu.memory_space<vmem>>, vector<32x32xf32>
    %cst_12 = arith.constant dense<0.000000e+00> : vector<8x32xf32>
    %12 = tpu.matmul %10, %11, %cst_12 {dimension_numbers = #tpu.dot_dimension_numbers<[1], [0], [0], [1], [0, 0, 1, 1], [], []>} : vector<8x32xf32>, vector<32x32xf32>, vector<8x32xf32> -> vector<8x32xf32>
    %c0_13 = arith.constant 0 : index
    %c0_14 = arith.constant 0 : index
    %13 = vector.load %arg6[%c0_13, %c0_14] : memref<1x32xf32, #tpu.memory_space<vmem>>, vector<1x32xf32>
    %14 = vector.broadcast %13 : vector<1x32xf32> to vector<8x32xf32>
    %15 = arith.addf %12, %14 : vector<8x32xf32>
    %c0_15 = arith.constant 0 : index
    %c0_16 = arith.constant 0 : index
    %16 = vector.load %arg7[%c0_15, %c0_16] : memref<6x32xf32, #tpu.memory_space<vmem>>, vector<6x32xf32>
    %cst_17 = arith.constant dense<0.000000e+00> : vector<128x32xf32>
    %17 = tpu.matmul %3, %16, %cst_17 {dimension_numbers = #tpu.dot_dimension_numbers<[1], [0], [0], [1], [0, 0, 1, 1], [], []>} : vector<128x6xf32>, vector<6x32xf32>, vector<128x32xf32> -> vector<128x32xf32>
    %c0_18 = arith.constant 0 : index
    %c0_19 = arith.constant 0 : index
    %18 = vector.load %arg8[%c0_18, %c0_19] : memref<1x32xf32, #tpu.memory_space<vmem>>, vector<1x32xf32>
    %19 = vector.broadcast %18 : vector<1x32xf32> to vector<128x32xf32>
    %20 = arith.addf %17, %19 : vector<128x32xf32>
    %cst_20 = arith.constant 0.000000e+00 : f32
    %21 = vector.broadcast %cst_20 : f32 to vector<128x32xf32>
    %22 = arith.maximumf %20, %21 : vector<128x32xf32>
    %c0_21 = arith.constant 0 : index
    %c0_22 = arith.constant 0 : index
    %23 = vector.load %arg9[%c0_21, %c0_22] : memref<32x32xf32, #tpu.memory_space<vmem>>, vector<32x32xf32>
    %cst_23 = arith.constant dense<0.000000e+00> : vector<128x32xf32>
    %24 = tpu.matmul %22, %23, %cst_23 {dimension_numbers = #tpu.dot_dimension_numbers<[1], [0], [0], [1], [0, 0, 1, 1], [], []>} : vector<128x32xf32>, vector<32x32xf32>, vector<128x32xf32> -> vector<128x32xf32>
    %c0_24 = arith.constant 0 : index
    %c0_25 = arith.constant 0 : index
    %25 = vector.load %arg10[%c0_24, %c0_25] : memref<1x32xf32, #tpu.memory_space<vmem>>, vector<1x32xf32>
    %26 = vector.broadcast %25 : vector<1x32xf32> to vector<128x32xf32>
    %27 = arith.addf %24, %26 : vector<128x32xf32>
    %cst_26 = arith.constant dense<0.000000e+00> : vector<8x128xf32>
    %28 = tpu.matmul %15, %27, %cst_26 {dimension_numbers = #tpu.dot_dimension_numbers<[1], [1], [0], [0], [0, 0, 1, 0], [], []>} : vector<8x32xf32>, vector<128x32xf32>, vector<8x128xf32> -> vector<8x128xf32>
    %c0_27 = arith.constant 0 : index
    %c0_28 = arith.constant 0 : index
    %c0_29 = arith.constant 0 : index
    %29 = vector.load %arg11[%c0_27, %c0_28, %c0_29] : memref<1x8x128xf32, #tpu.memory_space<vmem>>, vector<1x8x128xf32>
    %30 = vector.shape_cast %29 : vector<1x8x128xf32> to vector<8x128xf32>
    %31 = vector.shape_cast %28 : vector<8x128xf32> to vector<1x8x128xf32>
    tpu.vector_store %arg11[%c0_27, %c0_28, %c0_29], %31 {strides = array<i32>} : memref<1x8x128xf32, #tpu.memory_space<vmem>>, vector<1x8x128xf32>,
    return
  }
  func.func @transform_0(%arg0: i32) -> (i32, i32, i32) {
    %c0_i32 = arith.constant 0 : i32
    %c0_i32_0 = arith.constant 0 : i32
    %c0_i32_1 = arith.constant 0 : i32
    return %arg0, %c0_i32, %c0_i32_0 : i32, i32, i32
  }
  func.func @transform_1(%arg0: i32) -> (i32, i32, i32) {
    %c0_i32 = arith.constant 0 : i32
    %c0_i32_0 = arith.constant 0 : i32
    %c0_i32_1 = arith.constant 0 : i32
    return %arg0, %c0_i32, %c0_i32_0 : i32, i32, i32
  }
  func.func @transform_2(%arg0: i32) -> (i32, i32) {
    %c0_i32 = arith.constant 0 : i32
    %c0_i32_0 = arith.constant 0 : i32
    %c0_i32_1 = arith.constant 0 : i32
    return %c0_i32, %c0_i32_0 : i32, i32
  }
  func.func @transform_3(%arg0: i32) -> (i32, i32) {
    %c0_i32 = arith.constant 0 : i32
    %c0_i32_0 = arith.constant 0 : i32
    %c0_i32_1 = arith.constant 0 : i32
    return %c0_i32, %c0_i32_0 : i32, i32
  }
  func.func @transform_4(%arg0: i32) -> (i32, i32) {
    %c0_i32 = arith.constant 0 : i32
    %c0_i32_0 = arith.constant 0 : i32
    %c0_i32_1 = arith.constant 0 : i32
    return %c0_i32, %c0_i32_0 : i32, i32
  }
  func.func @transform_5(%arg0: i32) -> (i32, i32) {
    %c0_i32 = arith.constant 0 : i32
    %c0_i32_0 = arith.constant 0 : i32
    %c0_i32_1 = arith.constant 0 : i32
    return %c0_i32, %c0_i32_0 : i32, i32
  }
  func.func @transform_6(%arg0: i32) -> (i32, i32) {
    %c0_i32 = arith.constant 0 : i32
    %c0_i32_0 = arith.constant 0 : i32
    %c0_i32_1 = arith.constant 0 : i32
    return %c0_i32, %c0_i32_0 : i32, i32
  }
  func.func @transform_7(%arg0: i32) -> (i32, i32) {
    %c0_i32 = arith.constant 0 : i32
    %c0_i32_0 = arith.constant 0 : i32
    %c0_i32_1 = arith.constant 0 : i32
    return %c0_i32, %c0_i32_0 : i32, i32
  }
  func.func @transform_8(%arg0: i32) -> (i32, i32) {
    %c0_i32 = arith.constant 0 : i32
    %c0_i32_0 = arith.constant 0 : i32
    %c0_i32_1 = arith.constant 0 : i32
    return %c0_i32, %c0_i32_0 : i32, i32
  }
  func.func @transform_9(%arg0: i32) -> (i32, i32) {
    %c0_i32 = arith.constant 0 : i32
    %c0_i32_0 = arith.constant 0 : i32
    %c0_i32_1 = arith.constant 0 : i32
    return %c0_i32, %c0_i32_0 : i32, i32
  }
  func.func @transform_10(%arg0: i32) -> (i32, i32, i32) {
    %c0_i32 = arith.constant 0 : i32
    %c0_i32_0 = arith.constant 0 : i32
    %c0_i32_1 = arith.constant 0 : i32
    return %arg0, %c0_i32, %c0_i32_0 : i32, i32, i32
  }
}

</mosaic_0001>

<bundles_post_ra>
// kernel: tpu_custom_call.1
= control target key start
LH: loop header
LB: loop body
LE: loop exit
PB: predicated region body
PF: predicated region fallthrough
CT: control target
= control target key end

     0   :  { %15 = vsyncpa [#allocation3], 0  ;;  %s1898_s0 = inlined_call_operand.vmem [shape: f32[2,8,4], index: 0, kind: input, shape index: {}]   ;;  %s1899_s1 = inlined_call_operand.vmem [shape: f32[2,128,6], index: 1, kind: input, shape index: {}]   ;;  %s1900_s2 = inlined_call_operand.vmem [shape: f32[4,32], index: 2, kind: input, shape index: {}]   ;;  %s1901_s3 = inlined_call_operand.vmem [shape: f32[1,32], index: 3, kind: input, shape index: {}]   ;;  %s1902_s4 = inlined_call_operand.vmem [shape: f32[32,32], index: 4, kind: input, shape index: {}]   ;;  %s1903_s5 = inlined_call_operand.vmem [shape: f32[1,32], index: 5, kind: input, shape index: {}]   ;;  %s1904_s6 = inlined_call_operand.vmem [shape: f32[6,32], index: 6, kind: input, shape index: {}]   ;;  %s1905_s7 = inlined_call_operand.vmem [shape: f32[1,32], index: 7, kind: input, shape index: {}]   ;;  %s1906_s8 = inlined_call_operand.vmem [shape: f32[32,32], index: 8, kind: input, shape index: {}]   ;;  %s1907_s9 = inlined_call_operand.vmem [shape: f32[1,32], index: 9, kind: input, shape index: {}]   ;;  %s1908_s10 = inlined_call_operand.hbm [shape: f32[2,8,128], index: 10, kind: output, shape index: {}]  }
   0x1   :  { %17 = vsyncpa [#allocation3 + $0x1], 0  ;;  %s1648_s13 = smov 0   ;;  %s1650_s14 = smov 0  }
   0x2   :  { %s1652_s15 = smov 0   ;;  %s1654_s16 = smov 0  }
   0x3 LB: > { %s1669_s17 = sadd.s32 4294967295, %s1587_s16   ;;  %s1197_s18 = sadd.s32 4294967294, %s1587_s16   ;;  %s1587_s16 = sphi %s1654_s16, %s1916_s16   ;;  %s1583_s15 = sphi %s1652_s15, %s1915_s15   ;;  %s1579_s14 = sphi %s1650_s14, %s1914_s14   ;;  %s1575_s13 = sphi %s1648_s13, %s1913_s13  }
   0x4   : > { %s1673_s19 = sadd.s32 1, %s1587_s16   ;;  %s250_s20 = sadd.s32 1, %s1583_s15 }
   0x5   : > { %s247_s21 = ssub.s32 %s1587_s16, %s1673_s19  ;;  %p260_p0 = scmp.ne.s32.totalorder %s1583_s15, %s1579_s14 }
   0x6   : > { %p248_p1 = scmp.eq.s32.totalorder %s247_s21, 0  ;;  %p261_p2 = scmp.eq.s32.totalorder %s1669_s17, 1 }
   0x7   : > { %p266_p3 = scmp.ne.s32.totalorder %s1579_s14, %s1575_s13  ;;  %p267_p4 = scmp.eq.s32.totalorder %s1197_s18, 1 }
   0x8   : > { %s1684_s22 = scalar_select %p248_p1, %s1583_s15, %s250_s20  }
   0x9   : > { %p1686_p5 = por %p261_p2, %p260_p0  ;;  %p1690_p6 = por %p267_p4, %p266_p3 }
   0xa   : > { %p1200_p7 = scmp.ge.s32.totalorder %s1587_s16, 1  ;;  %p324_p8 = scmp.lt.s32.totalorder %s1587_s16, 3 }
   0xc   : > { %p325_p9 = pnand %p1200_p7, %p324_p8 }
   0xd   : > { %v392_v0 = vld [vmem:[%s1900_s2] sm:$0xf] (!%p325_p9)  ;;  %vm404_vm0 = vcmask (!%p325_p9), 1043456   ;;  %p366_p10 = scmp.lt.s32.totalorder (!%p325_p9), %s1669_s17, 1  ;;  %v1589_v1 = vmov (!%p325_p9), 0.0   ;;  %vm1590_vm1 = vmmov (!%p325_p9), 0  }
   0xe   : > { %328 = sbr.rel (%p325_p9) target bundleno = 756 (0x2f4), region = 60  ;;  %1328 = vmatprep.subr.mxu1 (!%p325_p9), %v1589_v1  ;;  %1330 = vmatprep.mubr.msk.f32.mxu1 (!%p325_p9), %vm1590_vm1, %v1589_v1  ;;  %v564_v2 = vld [vmem:[%s1904_s6] sm:$0x3f] (!%p325_p9)  ;;  %vm621_vm2 = vcmask (!%p325_p9), 1045504   ;;  %v480_v4 = vld [vmem:[%s1902_s4 + $0x8] sm:$0xff] (!%p325_p9)  ;;  %v1591_v5 = vmov (!%p325_p9), 0.0|0.0  }
   0xf   : > { %1329 = vmatpush3.msk.msra.mxu1 (!%p325_p9), %vm404_vm0, %v392_v0  ;;  %1344 = vmatprep.subr.msk.mxu0 (!%p325_p9), %vm621_vm2, %v564_v2  ;;  %v479_v3 = vld [vmem:[%s1902_s4] sm:$0xff] (!%p325_p9)  ;;  %vm400_vm3 = vcmask (!%p325_p9), 31744   ;;  %vm572_vm4 = vcmask (!%p325_p9), 48128   ;;  %v481_v24 = vld [vmem:[%s1902_s4 + $0x10] sm:$0xff] (!%p325_p9)  ;;  %v482_v25 = vld [vmem:[%s1902_s4 + $0x18] sm:$0xff] (!%p325_p9)  ;;  %vm490_vm5 = vcmask (!%p325_p9), 261120  }
  0x10   : > { %1345 = vmatpush3.msk.msra.mxu0 (!%p325_p9), %vm621_vm2, %v564_v2  ;;  %1437 = vmatprep.subr.bf16.mxu1 (!%p325_p9), %v1591_v5  ;;  %v1438_v6 = vpack.c.bf16 (!%p325_p9), %v480_v4, %v479_v3  ;;  %v1441_v26 = vpack.c.bf16 (!%p325_p9), %v482_v25, %v481_v24  ;;  %v786_v27 = vld [vmem:[%s1906_s8] sm:$0xff] (!%p325_p9)  ;;  %v787_v28 = vld [vmem:[%s1906_s8 + $0x8] sm:$0xff] (!%p325_p9)  ;;  %v788_v33 = vld [vmem:[%s1906_s8 + $0x10] sm:$0xff] (!%p325_p9)  ;;  %s363_s30 = sand.u32 (!%p325_p9), 1, %s1579_s14   ;;  %s1263_s18 = sshll.u32 (!%p325_p9), %s1669_s17, 7 }
  0x11   : > { %1451 = vmatprep.subr.bf16.mxu0 (!%p325_p9), %v1591_v5  ;;  %v1443_v29 = vpack.c.bf16 (!%p325_p9), %v787_v28, %v786_v27  ;;  %v1205_v30 = vld [vmem:[%s1901_s3] ss:$0 sm:$0xff] (!%p325_p9)  ;;  %v789_v34 = vld [vmem:[%s1906_s8 + $0x18] sm:$0xff] (!%p325_p9)  ;;  %vm1820_vm6 = vmpackc.low (!%p325_p9), %vm490_vm5, %vm490_vm5  ;;  %s1858_s25 = scalar_lea.hbm (!%p325_p9), %s1908_s10, %s1263_s18  ;;  %s1113_s26 = scalar_lea.sflag (!%p325_p9), [#allocation3], %s363_s30 }
  0x12   : > { %v1774_v32 = vld [vmem:[%s1905_s7] ss:$0 sm:$0xff] (!%p325_p9)  ;;  %v1447_v41 = vpack.c.bf16 (!%p325_p9), %v789_v34, %v788_v33 }
  0x15   : > { %s367_s29 = scalar_select %p366_p10, %s1669_s17, 1 }
  0x16   : > { %s1592_s17 = smov [#allocation2]  }
  0x17   : > { %s1202_s20 = sshll.u32 %s367_s29, 3  ;;  %s1266_s21 = sshll.u32 %s367_s29, 7 }
  0x18   : > { %s369_s27 = scalar_lea.vmem %s1898_s0, %s1202_s20  ;;  %s1719_s11 = scalar_lea.vmem %s1899_s1, %s1266_s21 }
  0x19   : > { %v375_v7 = vld [vmem:[%s369_s27] sm:$0xff]  ;;  %v377_v9 = vld [vmem:[%s1719_s11 + $0x8] sm:$0xff]  ;;  %v378_v10 = vld [vmem:[%s1719_s11 + $0x10] sm:$0xff]  ;;  %s1529_s28 = sshll.u32 %s1592_s17, 4  ;;  %s1530_s28 = int_to_ptr.vmem [resolvable:$false] %s1529_s28 }
  0x1a   : > { %v376_v8 = vld [vmem:[%s1719_s11] sm:$0xff]  ;;  %1331 = vmatmul.mubr.msk.f32.vlgmr.msra.gmra.mrb[0].mxu1 %vm400_vm3, %v375_v7  ;;  %v379_v11 = vld [vmem:[%s1719_s11 + $0x18] sm:$0xff]  ;;  %v381_v13 = vld [vmem:[%s1719_s11 + $0x28] sm:$0xff] }
  0x1b   : > { %1346 = vmatprep.mubr.msk.f32.mxu0 %vm572_vm4, %v376_v8  ;;  %1439 = vmatpush3.bf16.msra.mxu1 %v1438_v6  ;;  %v380_v12 = vld [vmem:[%s1719_s11 + $0x20] sm:$0xff]  ;;  %v382_v14 = vld [vmem:[%s1719_s11 + $0x30] sm:$0xff]  ;;  %v383_v15 = vld [vmem:[%s1719_s11 + $0x38] sm:$0xff] }
  0x1c   : > { %1347 = vmatmul.mubr.msk.f32.vlgmr.msra.gmra.mrb[0].mxu0 %vm572_vm4, %v377_v9  ;;  %1440 = vmatprep.subr.bf16.mxu1 %v1591_v5  ;;  %v384_v16 = vld [vmem:[%s1719_s11 + $0x40] sm:$0xff]  ;;  %v385_v17 = vld [vmem:[%s1719_s11 + $0x48] sm:$0xff]  ;;  %v386_v18 = vld [vmem:[%s1719_s11 + $0x50] sm:$0xff] }
  0x1d   : > { %1349 = vmatprep.mubr.msk.f32.mxu0 %vm572_vm4, %v378_v10  ;;  %1341 = vmatprep.mubr.msk.f32.mxu1 %vm1590_vm1, %v1589_v1  ;;  %v387_v19 = vld [vmem:[%s1719_s11 + $0x58] sm:$0xff]  ;;  %v388_v20 = vld [vmem:[%s1719_s11 + $0x60] sm:$0xff]  ;;  %v389_v21 = vld [vmem:[%s1719_s11 + $0x68] sm:$0xff] }
  0x1e   : > { %v390_v22 = vld [vmem:[%s1719_s11 + $0x70] sm:$0xff]  ;;  %v391_v23 = vld [vmem:[%s1719_s11 + $0x78] sm:$0xff]  ;;  %s1201_s11 = sshll.u32 %s363_s30, 3 }
  0x1f   : > { %1442 = vmatpush3.bf16.msra.mxu1 %v1441_v26  ;;  %v1228_v26 = vld [vmem:[%s1907_s9] ss:$0 sm:$0xff]  ;;  %s365_s29 = scalar_lea.vmem [#allocation2], %s1201_s11  ;;  %s1531_s11 = scalar_lea.vmem %s1530_s28, 256 }
  0x20   : > { %1350 = vmatmul.mubr.msk.f32.gmra.mrb[2].mxu0 %vm572_vm4, %v379_v11  ;;  %1444 = vmatprep.subr.bf16.mxu1 %v1443_v29  ;;  %s1126_s12 = sshll.u32 %s365_s29, 4  ;;  %s1853_s12 = int_to_ptr.vmem [resolvable:$true] %s1126_s12 }
  0x21   : > { %1352 = vmatprep.mubr.msk.f32.mxu0 %vm572_vm4, %v380_v12  ;;  %s1525_s27 = scalar_lea.vmem %s1853_s12, 128  ;;  %p1532_p0 = scmp.lt.s32.totalorder %s1853_s12, %s1530_s28 }
  0x22   : > { %p1526_p11 = scmp.ne.s32.totalorder %s1853_s12, %s1525_s27  ;;  %p1533_p1 = scmp.lt.s32.totalorder %s1531_s11, %s1525_s27 }
  0x24   : > { %1353 = vmatmul.mubr.msk.f32.gmra.mrb[4].mxu0 %vm572_vm4, %v381_v13  ;;  %p1527_p12 = pnand %p1526_p11, %p1686_p5  ;;  %p1534_p2 = por %p1533_p1, %p1532_p0 }
  0x25   : > { %1355 = vmatprep.mubr.msk.f32.mxu0 %vm572_vm4, %v382_v14 }
  0x26   : > { %p1528_p13 = pneg %p1527_p12 }
  0x28   : > { %1356 = vmatmul.mubr.msk.f32.gmra.mrb[6].mxu0 %vm572_vm4, %v383_v15  ;;  %p1535_p3 = pnand %p1534_p2, %p1528_p13 }
  0x29   : > { %1358 = vmatprep.mubr.msk.f32.mxu0 %vm572_vm4, %v384_v16 }
  0x2c   : > { %1359 = vmatmul.mubr.msk.f32.gmra.mrb[8].mxu0 %vm572_vm4, %v385_v17 }
  0x2d   : > { %1361 = vmatprep.mubr.msk.f32.mxu0 %vm572_vm4, %v386_v18 }
  0x30   : > { %1362 = vmatmul.mubr.msk.f32.gmra.mrb[10].mxu0 %vm572_vm4, %v387_v19 }
  0x31   : > { %1364 = vmatprep.mubr.msk.f32.mxu0 %vm572_vm4, %v388_v20 }
  0x34   : > { %1365 = vmatmul.mubr.msk.f32.gmra.mrb[12].mxu0 %vm572_vm4, %v389_v21 }
  0x35   : > { %1367 = vmatprep.mubr.msk.f32.mxu0 %vm572_vm4, %v390_v22 }
  0x38   : > { %1368 = vmatmul.mubr.msk.f32.gmra.mrb[14].mxu0 %vm572_vm4, %v391_v23 }
  0x39   : > { %1434 = vmatprep.mubr.msk.f32.mxu0 %vm1590_vm1, %v1589_v1 }
  0xed   : > { %v474_v31 = vpop.f32.mrb[0].mxu1 }
  0xee   : > { %v475_v35 = vadd.f32 %v1205_v30, %v474_v31  ;;  %v1332_v36 = vpop.f32.mrb[1].mxu1 }
  0xef   : > { %v1348_v37 = vpop.f32.mrb[0].mxu0 }
  0xf0   : > { %v691_v38 = vpop.f32.mrb[1].mxu0  ;;  %v478_v39 = vmax.f32 %v475_v35, 0.0  ;;  %v697_v45 = vadd.f32 %v1348_v37, %v1774_v32 }
  0xf1   : > { %v692_v40 = vadd.f32 %v1774_v32, %v691_v38 }
  0xf2   : > { %1342 = vmatmul.mubr.msk.f32.vlgmr.msra.gmra.mrb[2].mxu1 %vm490_vm5, %v478_v39  ;;  %v771_v51 = vmax.f32 %v697_v45, 0.0 }
  0xf3   : > { %v770_v42 = vmax.f32 %v692_v40, 0.0  ;;  %v1351_v43 = vpop.f32.mrb[2].mxu0  ;;  %1446 = vmatpush3.bf16.msra.mxu1 %v1443_v29 }
  0xf4   : > { %v701_v44 = vpop.f32.mrb[3].mxu0  ;;  %1448 = vmatprep.subr.bf16.mxu1 %v1447_v41  ;;  %v707_v47 = vadd.f32 %v1351_v43, %v1774_v32 }
  0xf5   : > { %1378 = vmatprep.mubr.msk.f32.mxu1 %vm490_vm5, %v770_v42  ;;  %v702_v46 = vadd.f32 %v1774_v32, %v701_v44 }
  0xf6   : > { %v773_v53 = vmax.f32 %v707_v47, 0.0 }
  0xf7   : > { %v1354_v48 = vpop.f32.mrb[4].mxu0  ;;  %1450 = vmatpush3.bf16.msra.mxu1 %v1447_v41  ;;  %v772_v49 = vmax.f32 %v702_v46, 0.0 }
  0xf8   : > { %v711_v50 = vpop.f32.mrb[5].mxu0  ;;  %v717_v54 = vadd.f32 %v1354_v48, %v1774_v32 }
  0xf9   : > { %v712_v52 = vadd.f32 %v1774_v32, %v711_v50 }
  0xfa   : > { %1379 = vmatmul.mubr.msk.f32.vlgmr.msra.gmra.mrb[4].mxu1 %vm490_vm5, %v771_v51  ;;  %v775_v59 = vmax.f32 %v717_v54, 0.0 }
  0xfb   : > { %v1357_v55 = vpop.f32.mrb[6].mxu0  ;;  %1381 = vmatprep.mubr.msk.f32.mxu1 %vm490_vm5, %v772_v49  ;;  %v774_v56 = vmax.f32 %v712_v52, 0.0 }
  0xfc   : > { %v721_v57 = vpop.f32.mrb[7].mxu0  ;;  %v727_v60 = vadd.f32 %v1357_v55, %v1774_v32 }
  0xfd   : > { %v722_v58 = vadd.f32 %v1774_v32, %v721_v57 }
  0xfe   : > { %1382 = vmatmul.mubr.msk.f32.gmra.mrb[6].mxu1 %vm490_vm5, %v773_v53  ;;  %v777_v1 = vmax.f32 %v727_v60, 0.0 }
  0xff   : > { %v1360_v61 = vpop.f32.mrb[8].mxu0  ;;  %1384 = vmatprep.mubr.msk.f32.mxu1 %vm490_vm5, %v774_v56  ;;  %v776_v62 = vmax.f32 %v722_v58, 0.0 }
 0x100   : > { %v731_v63 = vpop.f32.mrb[9].mxu0  ;;  %v737_v2 = vadd.f32 %v1360_v61, %v1774_v32 }
 0x101   : > { %v732_v0 = vadd.f32 %v1774_v32, %v731_v63 }
 0x102   : > { %1385 = vmatmul.mubr.msk.f32.gmra.mrb[8].mxu1 %vm490_vm5, %v775_v59  ;;  %v779_v8 = vmax.f32 %v737_v2, 0.0 }
 0x103   : > { %v1363_v3 = vpop.f32.mrb[10].mxu0  ;;  %1387 = vmatprep.mubr.msk.f32.mxu1 %vm490_vm5, %v776_v62  ;;  %v778_v4 = vmax.f32 %v732_v0, 0.0 }
 0x104   : > { %v741_v6 = vpop.f32.mrb[11].mxu0  ;;  %v747_v9 = vadd.f32 %v1363_v3, %v1774_v32 }
 0x105   : > { %v742_v7 = vadd.f32 %v1774_v32, %v741_v6 }
 0x106   : > { %1388 = vmatmul.mubr.msk.f32.gmra.mrb[10].mxu1 %vm490_vm5, %v777_v1  ;;  %v781_v14 = vmax.f32 %v747_v9, 0.0 }
 0x107   : > { %v1366_v10 = vpop.f32.mrb[12].mxu0  ;;  %1390 = vmatprep.mubr.msk.f32.mxu1 %vm490_vm5, %v778_v4  ;;  %v780_v11 = vmax.f32 %v742_v7, 0.0  ;;  %v1208_v4 = vld [vmem:[%s1903_s5] ss:$0 sm:$0xff] }
 0x108   : > { %v751_v12 = vpop.f32.mrb[13].mxu0  ;;  %v757_v15 = vadd.f32 %v1366_v10, %v1774_v32 }
 0x109   : > { %v752_v13 = vadd.f32 %v1774_v32, %v751_v12 }
 0x10a   : > { %1391 = vmatmul.mubr.msk.f32.gmra.mrb[12].mxu1 %vm490_vm5, %v779_v8  ;;  %v783_v20 = vmax.f32 %v757_v15, 0.0 }
 0x10b   : > { %v1369_v16 = vpop.f32.mrb[14].mxu0  ;;  %1393 = vmatprep.mubr.msk.f32.mxu1 %vm490_vm5, %v780_v11  ;;  %v782_v17 = vmax.f32 %v752_v13, 0.0 }
 0x10c   : > { %v761_v18 = vpop.f32.mrb[15].mxu0  ;;  %v767_v21 = vadd.f32 %v1369_v16, %v1774_v32 }
 0x10d   : > { %v762_v19 = vadd.f32 %v1774_v32, %v761_v18 }
 0x10e   : > { %1394 = vmatmul.mubr.msk.f32.gmra.mrb[14].mxu1 %vm490_vm5, %v781_v14  ;;  %v785_v23 = vmax.f32 %v767_v21, 0.0 }
 0x10f   : > { %1396 = vmatprep.mubr.msk.f32.mxu1 %vm490_vm5, %v782_v17  ;;  %v784_v22 = vmax.f32 %v762_v19, 0.0 }
 0x112   : > { %1397 = vmatmul.mubr.msk.f32.gmra.mrb[16].mxu1 %vm490_vm5, %v783_v20 }
 0x113   : > { %1399 = vmatprep.mubr.msk.f32.mxu1 %vm490_vm5, %v784_v22 }
 0x116   : > { %1400 = vmatmul.mubr.msk.f32.gmra.mrb[18].mxu1 %vm490_vm5, %v785_v23 }
 0x1c5   : > { %v560_v24 = vpop.f32.mrb[2].mxu1 }
 0x1c6   : > { %v1343_v25 = vpop.f32.mrb[3].mxu1  ;;  %v561_v6 = vadd.f32 %v1208_v4, %v560_v24 }
 0x1cd   : > { %v1380_v27 = vpop.f32.mrb[4].mxu1 }
 0x1ce   : > { %v917_v28 = vadd.f32 %v1380_v27, %v1228_v26  ;;  %v911_v29 = vpop.f32.mrb[5].mxu1 }
 0x1cf   : > { %v912_v30 = vadd.f32 %v1228_v26, %v911_v29 }
 0x1d1   : > { %v1452_v32 = vpack.c.bf16 %v917_v28, %v912_v30  ;;  %v1383_v33 = vpop.f32.mrb[6].mxu1 }
 0x1d2   : > { %v927_v34 = vadd.f32 %v1383_v33, %v1228_v26  ;;  %v921_v35 = vpop.f32.mrb[7].mxu1 }
 0x1d3   : > { %v922_v36 = vadd.f32 %v1228_v26, %v921_v35  ;;  %1454 = vmatpush3.bf16.xpose.msk.msra.mxu0 %vm1820_vm6, %v1452_v32 }
 0x1d4   : > { %1455 = vmatprep.subr.bf16.mxu0 %v1591_v5 }
 0x1d5   : > { %v1456_v37 = vpack.c.bf16 %v927_v34, %v922_v36  ;;  %v1386_v38 = vpop.f32.mrb[8].mxu1 }
 0x1d6   : > { %v937_v39 = vadd.f32 %v1386_v38, %v1228_v26  ;;  %v931_v40 = vpop.f32.mrb[9].mxu1 }
 0x1d7   : > { %v932_v41 = vadd.f32 %v1228_v26, %v931_v40 }
 0x1d9   : > { %v1460_v42 = vpack.c.bf16 %v937_v39, %v932_v41  ;;  %v1389_v43 = vpop.f32.mrb[10].mxu1 }
 0x1da   : > { %v947_v44 = vadd.f32 %v1389_v43, %v1228_v26  ;;  %v941_v45 = vpop.f32.mrb[11].mxu1 }
 0x1db   : > { %1458 = vmatpush3.bf16.xpose.msk.msra.mxu0 %vm1820_vm6, %v1456_v37  ;;  %v942_v46 = vadd.f32 %v1228_v26, %v941_v45 }
 0x1dc   : > { %1459 = vmatprep.subr.bf16.mxu0 %v1591_v5 }
 0x1dd   : > { %v1464_v47 = vpack.c.bf16 %v947_v44, %v942_v46  ;;  %v1392_v48 = vpop.f32.mrb[12].mxu1 }
 0x1de   : > { %v957_v49 = vadd.f32 %v1392_v48, %v1228_v26  ;;  %v951_v50 = vpop.f32.mrb[13].mxu1 }
 0x1df   : > { %v952_v51 = vadd.f32 %v1228_v26, %v951_v50 }
 0x1e1   : > { %v1468_v52 = vpack.c.bf16 %v957_v49, %v952_v51  ;;  %v1395_v53 = vpop.f32.mrb[14].mxu1 }
 0x1e2   : > { %v967_v54 = vadd.f32 %v1395_v53, %v1228_v26  ;;  %v961_v55 = vpop.f32.mrb[15].mxu1 }
 0x1e3   : > { %1462 = vmatpush3.bf16.xpose.msk.msra.mxu0 %vm1820_vm6, %v1460_v42  ;;  %v962_v56 = vadd.f32 %v1228_v26, %v961_v55 }
 0x1e4   : > { %1463 = vmatprep.subr.bf16.mxu0 %v1591_v5 }
 0x1e5   : > { %v1472_v57 = vpack.c.bf16 %v967_v54, %v962_v56  ;;  %v1398_v58 = vpop.f32.mrb[16].mxu1 }
 0x1e6   : > { %v977_v59 = vadd.f32 %v1398_v58, %v1228_v26  ;;  %v971_v60 = vpop.f32.mrb[17].mxu1 }
 0x1e7   : > { %v972_v61 = vadd.f32 %v1228_v26, %v971_v60 }
 0x1e9   : > { %v1476_v62 = vpack.c.bf16 %v977_v59, %v972_v61  ;;  %v1401_v63 = vpop.f32.mrb[18].mxu1 }
 0x1ea   : > { %v987_v0 = vadd.f32 %v1401_v63, %v1228_v26  ;;  %v981_v1 = vpop.f32.mrb[19].mxu1 }
 0x1eb   : > { %1466 = vmatpush3.bf16.xpose.msk.msra.mxu0 %vm1820_vm6, %v1464_v47  ;;  %v982_v2 = vadd.f32 %v1228_v26, %v981_v1 }
 0x1ec   : > { %1467 = vmatprep.subr.bf16.mxu0 %v1591_v5 }
 0x1ed   : > { %v1480_v3 = vpack.c.bf16 %v987_v0, %v982_v2 }
 0x1f3   : > { %1470 = vmatpush3.bf16.xpose.msk.msra.mxu0 %vm1820_vm6, %v1468_v52 }
 0x1f4   : > { %1471 = vmatprep.subr.bf16.mxu0 %v1591_v5 }
 0x1fb   : > { %1474 = vmatpush3.bf16.xpose.msk.msra.mxu0 %vm1820_vm6, %v1472_v57 }
 0x1fc   : > { %1475 = vmatprep.subr.bf16.mxu0 %v1591_v5 }
 0x203   : > { %1478 = vmatpush3.bf16.xpose.msk.msra.mxu0 %vm1820_vm6, %v1476_v62 }
 0x204   : > { %1479 = vmatprep.subr.bf16.mxu0 %v1591_v5 }
 0x20b   : > { %1482 = vmatpush3.bf16.xpose.msk.msra.mxu0 %vm1820_vm6, %v1480_v3 }
 0x212   : > { %1435 = vmatmul.mubr.msk.f32.vlgmr.msra.gmra.mrb[16].mxu0 %vm490_vm5, %v561_v6 }
 0x2e5   : > { %v1107_v5 = vpop.f32.mrb[16].mxu0 }
 0x2e6   : > { %1111 = vst [vmem:[%s365_s29] sm:$0xff] %v1107_v5  ;;  %v1436_v7 = vpop.f32.mrb[17].mxu0 }
 0x2e7   : > { %1538 = shalt.err (!%p1535_p3)
}
 0x2e8   : > { %s1539_s30 = scalar_lea.hbm %s1858_s25, 128  ;;  %s1543_s20 = scalar_lea.hbm %s1908_s10, 256 }
 0x2e9   : > { %p1540_p4 = scmp.ne.s32.totalorder %s1858_s25, %s1539_s30  ;;  %p1544_p9 = scmp.lt.u32.totalorder %s1858_s25, %s1908_s10 }
 0x2ea   : > { %p1545_p10 = scmp.lt.u32.totalorder %s1543_s20, %s1539_s30  ;;  %p1547_p12 = scmp.lt.u32.totalorder %s1539_s30, %s1858_s25 }
 0x2eb   : > { %p1541_p7 = pnand %p1540_p4, %p1686_p5 }
 0x2ec   : > { %p1546_p11 = por %p1545_p10, %p1544_p9 }
 0x2ed   : > { %p1542_p8 = pneg %p1541_p7 }
 0x2ee   : > { %p1548_p13 = por %p1547_p12, %p1546_p11 }
 0x2f0   : > { %p1549_p0 = pnand %p1548_p13, %p1542_p8 }
 0x2f2   : > { %1552 = shalt.err (!%p1549_p0)
}
 0x2f3   : > { %1483 = dma.vmem_to_hbm [thread:$0]  (%p1686_p5), %s1853_s12, 128, %s1858_s25, %s1113_s26  }
 0x2f4 PF: > { %p1489_p1 = scmp.ge.s32.totalorder %s1587_s16, 2  ;;  %s1138_s27 = sand.u32 1, %s1575_s13  }
 0x2f5   : > { %s1139_s28 = scalar_lea.sflag [#allocation3], %s1138_s27 }
 0x2f6   : > { %p1486_p2 = pnand %p1489_p1, %p1690_p6 }
 0x2f8   : > { %1570 = dma.done.wait (!%p1486_p2), %s1139_s28, 128  }
 0x2f9   : > { %1572 = vsyncadd (!%p1486_p2), %s1139_s28, 4294967168  ;;  %p20_p3 = scmp.ge.s32.totalorder %s1673_s19, 4   ;;  %s1913_s13 = smov %s1579_s14 }
 0x2fa   : > { %s1914_s14 = smov %s1583_s15  ;;  %s1915_s15 = smov %s1684_s22 }
 0x2fb   : > { %s1916_s16 = smov %s1673_s19  ;;  %22 = sbr.rel (!%p20_p3) target bundleno = 3 (0x3), region = 98 }
 0x302   :  { %1144 = vsyncpa [#allocation3], 1 }
 0x303   :  { %1146 = vsyncpa [#allocation3 + $0x1], 1 }

</bundles_post_ra>
